<compile_context>
chip_gen: v7x
topology: tpu7x:2x2x1
jax: 0.10.0
libtpu: 0.0.40
codegen_flags: <defaults>
</compile_context>

<pallas_src>
import functools

import jax
import jax.numpy as jnp
from jax import lax
from jax.experimental import pallas as pl
from jax.experimental.pallas import tpu as pltpu

_LANE = 128          # TPU lane width — logits padded to this in VMEM only.
_NEG_BIG = -1e30     # finite "-inf"; exp(-1e30 - m) underflows to exactly 0 (f32).


def _round_up(v, m):
    return ((v + m - 1) // m) * m


# ---------------------------------------------------------------------------
# Kernels
# ---------------------------------------------------------------------------

def _router_kernel(x_ref, w_ref, b_ref, o_ref, *, approx_recip):
    """Softmax over experts (dim=1). x:(TN,D) w:(D,E_pad) b:(1,E_pad) o:(TN,E)."""
    logits = jnp.dot(x_ref[...], w_ref[...], preferred_element_type=jnp.float32)
    logits = logits + b_ref[...]                       # padded cols carry -1e30
    m = jnp.max(logits, axis=-1, keepdims=True)
    p = jnp.exp(logits - m)                            # padded cols -> exactly 0
    denom = jnp.sum(p, axis=-1, keepdims=True)
    probs = p * pl.reciprocal(denom, approx=approx_recip)
    # Store only the real experts: output array is unpadded (N, E).
    o_ref[...] = probs[:, :o_ref.shape[-1]].astype(o_ref.dtype)


def _router_kernel_ec(x_ref, w_ref, b_ref, o_ref, m_ref, l_ref, *,
                      n_tokens, token_tile, approx_recip):
    """Softmax over tokens (dim=0): two-pass online softmax across token tiles.

    Pass 0 accumulates per-expert running max / sum-of-exp in VMEM scratch;
    pass 1 recomputes the (cheap, mem-bound) logits and normalizes + stores.
    """
    p_ax = pl.program_id(0)    # 0: accumulate column stats, 1: normalize + store
    i = pl.program_id(1)       # token tile

    @pl.when((p_ax == 0) & (i == 0))
    def _():
        m_ref[...] = jnp.full_like(m_ref, _NEG_BIG)
        l_ref[...] = jnp.zeros_like(l_ref)

    logits = jnp.dot(x_ref[...], w_ref[...], preferred_element_type=jnp.float32)
    logits = logits + b_ref[...]

    @pl.when(p_ax == 0)
    def _():
        lg = logits
        if n_tokens % token_tile != 0:
            # Partial last tile: keep garbage rows out of the column statistics.
            row = lax.broadcasted_iota(jnp.int32, logits.shape, 0) + i * token_tile
            lg = jnp.where(row < n_tokens, logits, _NEG_BIG)
        m_new = jnp.maximum(m_ref[...], jnp.max(lg, axis=0, keepdims=True))
        l_ref[...] = (l_ref[...] * jnp.exp(m_ref[...] - m_new)
                      + jnp.sum(jnp.exp(lg - m_new), axis=0, keepdims=True))
        m_ref[...] = m_new

    @pl.when(p_ax == 1)
    def _():
        probs = jnp.exp(logits - m_ref[...]) * pl.reciprocal(l_ref[...],
                                                             approx=approx_recip)
        o_ref[...] = probs[:, :o_ref.shape[-1]].astype(o_ref.dtype)


# ---------------------------------------------------------------------------
# Parameter prep (one-time, at module init) and forward wrapper
# ---------------------------------------------------------------------------

def prepare_router_params(weight, bias):
    """One-time prep: pad experts to a lane-aligned width with the softmax mask
    baked into the bias, and pre-transpose W so the kernel contracts
    (TN,D) x (D,E_pad) with no in-kernel transpose.

    weight: (E, D) nn.Linear layout;  bias: (E,)
    returns w_t: (D, E_pad) in weight dtype, b2: (1, E_pad) f32.
    """
    e, d = weight.shape
    e_pad = _round_up(max(e, 1), _LANE)
    w_t = jnp.pad(weight, ((0, e_pad - e), (0, 0))).T              # (D, E_pad)
    b2 = jnp.pad(bias.astype(jnp.float32), (0, e_pad - e),
                 constant_values=_NEG_BIG).reshape(1, e_pad)
    return w_t, b2


def router_forward(x, w_t, b2, num_experts, *, expert_choice=False,
                   token_tile=None, approx_reciprocal=True, out_dtype=None,
                   single_buffer_weights=False):
    """Pallas forward for SimpleRouterWithGLU.

    x: (N, D); w_t/b2 from prepare_router_params(); returns (N, num_experts)."""
    n, d = x.shape
    d_w, e_pad = w_t.shape
    assert d_w == d, "weight / input dim mismatch"
    e = num_experts
    out_dtype = x.dtype if out_dtype is None else out_dtype

    x_b = x.dtype.itemsize
    w_b = w_t.dtype.itemsize
    o_b = jnp.dtype(out_dtype).itemsize

    # ---- token tile: largest that keeps streaming buffers in a conservative
    #      budget (safe for v7x's 64 MiB VMEM as well as v5e/v6e's 128 MiB) ----
    if token_tile is None:
        budget = 24 << 20
        fixed = 2 * _round_up(d, 8) * e_pad * w_b + 4 * 8 * e_pad * 4
        per_row = 2 * _round_up(d, _LANE) * x_b + 2 * e_pad * o_b
        avail = max(budget - fixed, per_row * 128)
        tn = max(128, min(2048, (avail // per_row) // 128 * 128))
    else:
        tn = int(token_tile)
    if tn >= n:
        tn = n                       # single block (block dim == full array dim)
    else:
        tn = max(8, (tn // 8) * 8)   # second-minor block dim must be 8-aligned
    n_tiles = pl.cdiv(n, tn)

    # ---- explicit VMEM budget sized from the actual footprint ----
    need = (2 * _round_up(tn, 8) * _round_up(d, _LANE) * x_b   # x tiles (dbl-buf)
            + 2 * _round_up(d, 8) * e_pad * w_b                # pinned W
            + 4 * 8 * e_pad * 4                                # bias + ec scratch
            + 2 * _round_up(tn, 8) * e_pad * o_b)              # out tiles
    vmem_limit = int(min(max(need + (4 << 20), 32 << 20), 100 << 20))

    passes = 2 if expert_choice else 1
    cost = pl.CostEstimate(
        flops=int(passes * 2 * n * d * e_pad),
        transcendentals=int(passes * n * e_pad),
        bytes_accessed=int(passes * n * d * x_b + d * e_pad * w_b
                           + e_pad * 4 + n * e * o_b))

    # Pinned parameter blocks: constant block index -> DMA'd once, VMEM-resident.
    w_mode = dict(pipeline_mode=pl.Buffered(1)) if single_buffer_weights else {}

    if not expert_choice:
        kernel = functools.partial(_router_kernel, approx_recip=approx_reciprocal)
        grid = (n_tiles,)
        in_specs = [
            pl.BlockSpec((tn, d), lambda i: (i, 0)),             # streamed x tiles
            pl.BlockSpec((d, e_pad), lambda i: (0, 0), **w_mode),
            pl.BlockSpec((1, e_pad), lambda i: (0, 0), **w_mode),
        ]
        out_spec = pl.BlockSpec((tn, e), lambda i: (i, 0))
        scratch = []
        semantics = ("parallel",)            # independent row-softmax tiles
    else:
        kernel = functools.partial(_router_kernel_ec, n_tokens=n, token_tile=tn,
                                   approx_recip=approx_reciprocal)
        grid = (2, n_tiles)                  # pass 0: stats, pass 1: store
        in_specs = [
            pl.BlockSpec((tn, d), lambda p, i: (i, 0)),
            pl.BlockSpec((d, e_pad), lambda p, i: (0, 0), **w_mode),
            pl.BlockSpec((1, e_pad), lambda p, i: (0, 0), **w_mode),
        ]
        out_spec = pl.BlockSpec((tn, e), lambda p, i: (i, 0))
        scratch = [pltpu.VMEM((1, e_pad), jnp.float32),   # running column max
                   pltpu.VMEM((1, e_pad), jnp.float32)]   # running sum of exp
        semantics = ("arbitrary", "arbitrary")            # scratch carried across grid

    return pl.pallas_call(
        kernel,
        out_shape=jax.ShapeDtypeStruct((n, e), out_dtype),
        grid_spec=pltpu.PrefetchScalarGridSpec(
            num_scalar_prefetch=0,
            grid=grid,
            in_specs=in_specs,
            out_specs=out_spec,
            scratch_shapes=scratch,
        ),
        compiler_params=pltpu.CompilerParams(
            dimension_semantics=semantics,
            vmem_limit_bytes=vmem_limit),
        cost_estimate=cost,
    )(x, w_t, b2)


def simple_router_with_glu(x, weight, bias, **kwargs):
    """Convenience path matching the PyTorch module signature (re-preps params
    per call).  In a real model call prepare_router_params() once at init and
    use router_forward() directly."""
    w_t, b2 = prepare_router_params(weight, bias)
    return router_forward(x, w_t, b2, weight.shape[0], **kwargs)


def _reference(x, weight, bias, expert_choice=False):
    logits = x @ weight.T + bias
    return jax.nn.softmax(logits, axis=0 if expert_choice else 1)


if __name__ == "__main__":
    # Small shapes consistent with the module: N tokens, input_dim, num_experts.
    N, D, E = 16, 32, 8
    key = jax.random.PRNGKey(0)
    kx, kw, kb = jax.random.split(key, 3)

    x = jax.random.normal(kx, (N, D), dtype=jnp.float32)
    bound = 1.0 / (D ** 0.5)
    weight = jax.random.uniform(kw, (E, D), minval=-bound, maxval=bound,
                                dtype=jnp.float32)
    bias = jax.random.uniform(kb, (E,), minval=-bound, maxval=bound,
                              dtype=jnp.float32)

    # One-time parameter prep (module init), reused across all forwards below.
    w_t, b2 = prepare_router_params(weight, bias)

    # Default path: softmax over experts (dim=1), exact reciprocal.
    out = jax.block_until_ready(
        router_forward(x, w_t, b2, E, expert_choice=False, approx_reciprocal=False))
    ref = _reference(x, weight, bias, expert_choice=False)
    assert out.shape == (N, E)
    assert jnp.allclose(out, ref, atol=1e-5, rtol=1e-5), "mismatch vs reference"
    assert jnp.allclose(out.sum(axis=1), 1.0, atol=1e-5), "rows must sum to 1"

    # Production default: EUP approximate reciprocal (routing-grade accuracy).
    out_a = jax.block_until_ready(router_forward(x, w_t, b2, E))
    assert jnp.allclose(out_a, ref, atol=2e-3, rtol=2e-3), "mismatch (approx recip)"

    # expert_choice=True: softmax over tokens (dim=0), tiled two-pass online softmax.
    out_ec = jax.block_until_ready(
        router_forward(x, w_t, b2, E, expert_choice=True, approx_reciprocal=False))
    ref_ec = _reference(x, weight, bias, expert_choice=True)
    assert jnp.allclose(out_ec, ref_ec, atol=1e-5, rtol=1e-5), "mismatch (expert_choice)"
    assert jnp.allclose(out_ec.sum(axis=0), 1.0, atol=1e-5), "cols must sum to 1"

    # Larger token count with a forced small tile: multi-step pipelined grid and
    # a partial final token block, on both softmax axes.
    N2 = 1000
    x2 = jax.random.normal(jax.random.PRNGKey(1), (N2, D), dtype=jnp.float32)
    out2 = jax.block_until_ready(
        router_forward(x2, w_t, b2, E, token_tile=256, approx_reciprocal=False))
    ref2 = _reference(x2, weight, bias, expert_choice=False)
    assert out2.shape == (N2, E)
    assert jnp.allclose(out2, ref2, atol=1e-5, rtol=1e-5), "mismatch (tiled path)"

    out2_ec = jax.block_until_ready(
        router_forward(x2, w_t, b2, E, expert_choice=True, token_tile=256,
                       approx_reciprocal=False))
    ref2_ec = _reference(x2, weight, bias, expert_choice=True)
    assert jnp.allclose(out2_ec, ref2_ec, atol=1e-5, rtol=1e-5), \
        "mismatch (tiled expert_choice)"

    # Convenience wrapper matching the PyTorch module signature.
    out_c = jax.block_until_ready(
        simple_router_with_glu(x, weight, bias, approx_reciprocal=False))
    assert jnp.allclose(out_c, ref, atol=1e-5, rtol=1e-5), "mismatch (convenience wrapper)"

    print("KERNEL_OK")
</pallas_src>

<mosaic_0001>
module attributes {stable_mosaic.version = 11 : i64} {
  func.func @_router_kernel(%arg0: i32, %arg1: memref<16x32xf32, #tpu.memory_space<vmem>>, %arg2: memref<32x128xf32, #tpu.memory_space<vmem>>, %arg3: memref<1x128xf32, #tpu.memory_space<vmem>>, %arg4: memref<16x8xf32, #tpu.memory_space<vmem>>) attributes {dimension_semantics = [#tpu.dimension_semantics<parallel>], iteration_bounds = array<i64: 1>, scalar_prefetch = 0 : i64, scratch_operands = 0 : i64, tpu.core_type = #tpu.core_type<tc>, window_params = [{transform_indices = @transform_0, window_bounds = array<i64: 16, 32>}, {pipeline_mode = #tpu.pipeline_mode<synchronous>, transform_indices = @transform_1, window_bounds = array<i64: 32, 128>}, {pipeline_mode = #tpu.pipeline_mode<synchronous>, transform_indices = @transform_2, window_bounds = array<i64: 1, 128>}, {transform_indices = @transform_3, window_bounds = array<i64: 16, 8>}]} {
    %c0 = arith.constant 0 : index
    %c0_0 = arith.constant 0 : index
    %0 = vector.load %arg1[%c0, %c0_0] : memref<16x32xf32, #tpu.memory_space<vmem>>, vector<16x32xf32>
    %c0_1 = arith.constant 0 : index
    %c0_2 = arith.constant 0 : index
    %1 = vector.load %arg2[%c0_1, %c0_2] : memref<32x128xf32, #tpu.memory_space<vmem>>, vector<32x128xf32>
    %cst = arith.constant dense<0.000000e+00> : vector<16x128xf32>
    %2 = tpu.matmul %0, %1, %cst {dimension_numbers = #tpu.dot_dimension_numbers<[1], [0], [0], [1], [0, 0, 1, 1], [], []>} : vector<16x32xf32>, vector<32x128xf32>, vector<16x128xf32> -> vector<16x128xf32>
    %c0_3 = arith.constant 0 : index
    %c0_4 = arith.constant 0 : index
    %3 = vector.load %arg3[%c0_3, %c0_4] : memref<1x128xf32, #tpu.memory_space<vmem>>, vector<1x128xf32>
    %4 = vector.broadcast %3 : vector<1x128xf32> to vector<16x128xf32>
    %5 = arith.addf %2, %4 : vector<16x128xf32>
    %cst_5 = arith.constant dense<0xFF800000> : vector<16xf32>
    %6 = vector.multi_reduction <maximumf>, %5, %cst_5 [1] : vector<16x128xf32> to vector<16xf32>
    %7 = vector.shape_cast %6 : vector<16xf32> to vector<16x1xf32>
    %8 = vector.broadcast %7 : vector<16x1xf32> to vector<16x128xf32>
    %9 = arith.subf %5, %8 : vector<16x128xf32>
    %10 = math.exp %9 : vector<16x128xf32>
    %cst_6 = arith.constant dense<0.000000e+00> : vector<16xf32>
    %11 = vector.multi_reduction <add>, %10, %cst_6 [1] : vector<16x128xf32> to vector<16xf32>
    %12 = vector.shape_cast %11 : vector<16xf32> to vector<16x1xf32>
    %13 = tpu.reciprocal %12 : vector<16x1xf32> -> vector<16x1xf32>
    %14 = vector.broadcast %13 : vector<16x1xf32> to vector<16x128xf32>
    %15 = arith.mulf %10, %14 : vector<16x128xf32>
    %16 = vector.extract_strided_slice %15 {offsets = [0, 0], sizes = [16, 8], strides = [1, 1]} : vector<16x128xf32> to vector<16x8xf32>
    %c0_7 = arith.constant 0 : index
    %c0_8 = arith.constant 0 : index
    %17 = vector.load %arg4[%c0_7, %c0_8] : memref<16x8xf32, #tpu.memory_space<vmem>>, vector<16x8xf32>
    tpu.vector_store %arg4[%c0_7, %c0_8], %16 {strides = array<i32>} : memref<16x8xf32, #tpu.memory_space<vmem>>, vector<16x8xf32>,
    return
  }
  func.func @transform_0(%arg0: i32) -> (i32, i32) {
    %c0_i32 = arith.constant 0 : i32
    %c0_i32_0 = arith.constant 0 : i32
    return %arg0, %c0_i32 : i32, i32
  }
  func.func @transform_1(%arg0: i32) -> (i32, i32) {
    %c0_i32 = arith.constant 0 : i32
    %c0_i32_0 = arith.constant 0 : i32
    %c0_i32_1 = arith.constant 0 : i32
    return %c0_i32, %c0_i32_0 : i32, i32
  }
  func.func @transform_2(%arg0: i32) -> (i32, i32) {
    %c0_i32 = arith.constant 0 : i32
    %c0_i32_0 = arith.constant 0 : i32
    %c0_i32_1 = arith.constant 0 : i32
    return %c0_i32, %c0_i32_0 : i32, i32
  }
  func.func @transform_3(%arg0: i32) -> (i32, i32) {
    %c0_i32 = arith.constant 0 : i32
    %c0_i32_0 = arith.constant 0 : i32
    return %arg0, %c0_i32 : i32, i32
  }
}

</mosaic_0001>

<bundles_post_ra>
// kernel: tpu_custom_call.1
= control target key start
LH: loop header
LB: loop body
LE: loop exit
PB: predicated region body
PF: predicated region fallthrough
CT: control target
= control target key end

     0   :  { %8 = vsyncpa [#allocation3], 0  ;;  %s309_s0 = inlined_call_operand.hbm [shape: f32[16,32], index: 0, kind: input, shape index: {}]   ;;  %s310_s1 = inlined_call_operand.hbm [shape: f32[32,128], index: 1, kind: input, shape index: {}]   ;;  %s311_s2 = inlined_call_operand.vmem [shape: f32[1,128], index: 2, kind: input, shape index: {}]   ;;  %s312_s3 = inlined_call_operand.vmem [shape: f32[16,8], index: 3, kind: output, shape index: {}]  }
   0x1   :  { %9 = vsyncpa [#allocation5], 0  ;;  %s252_s12 = smov [#allocation2]   ;;  %s204_s16 = scalar_lea.hbm %s309_s0, 256 }
   0x2   :  { %s15_s13 = sshll.u32 %s252_s12, 4  ;;  %p205_p0 = scmp.ne.s32.totalorder %s309_s0, %s204_s16  ;;  %s16_s13 = int_to_ptr.vmem [resolvable:$true] %s15_s13 }
   0x3   :  { %p208_p1 = scmp.lt.u32.totalorder %s204_s16, %s309_s0 }
   0x5   :  { %p210_p2 = pnand %p208_p1, %p205_p0 }
   0x7   :  { %213 = shalt.err (!%p210_p2)
}
   0x8   :  { %s214_s21 = scalar_lea.vmem %s16_s13, 256  ;;  %p219_p4 = scmp.lt.s32.totalorder %s16_s13, %s16_s13 }
   0x9   :  { %p215_p3 = scmp.ne.s32.totalorder %s16_s13, %s214_s21  ;;  %p220_p5 = scmp.lt.s32.totalorder %s214_s21, %s214_s21 }
   0xb   :  { %p221_p6 = por %p220_p5, %p219_p4 }
   0xd   :  { %p222_p7 = pnand %p221_p6, %p215_p3 }
   0xf   :  { %225 = shalt.err (!%p222_p7)
}
  0x10   :  { %s253_s22 = smov 128   ;;  %s254_s23 = smov 8  }
  0x11   :  { %21 = dma.hbm_to_vmem [thread:$0]  %s309_s0, 256, %s16_s13, [#allocation3], %s253_s22, %s253_s22, %s254_s23  }
  0x12   :  { %s255_s26 = smov [#allocation4]   ;;  %s226_s30 = scalar_lea.hbm %s310_s1, 512 }
  0x13   :  { %s27_s27 = sshll.u32 %s255_s26, 4  ;;  %p227_p8 = scmp.ne.s32.totalorder %s310_s1, %s226_s30  ;;  %s28_s27 = int_to_ptr.vmem [resolvable:$true] %s27_s27 }
  0x14   :  { %p230_p9 = scmp.lt.u32.totalorder %s226_s30, %s310_s1 }
  0x16   :  { %p232_p10 = pnand %p230_p9, %p227_p8 }
  0x18   :  { %235 = shalt.err (!%p232_p10)
}
  0x19   :  { %s236_s8 = scalar_lea.vmem %s28_s27, 512  ;;  %p241_p12 = scmp.lt.s32.totalorder %s28_s27, %s28_s27 }
  0x1a   :  { %p237_p11 = scmp.ne.s32.totalorder %s28_s27, %s236_s8  ;;  %p242_p13 = scmp.lt.s32.totalorder %s236_s8, %s236_s8 }
  0x1c   :  { %p243_p0 = por %p242_p13, %p241_p12 }
  0x1e   :  { %p244_p1 = pnand %p243_p0, %p237_p11 }
  0x20   :  { %247 = shalt.err (!%p244_p1)
}
  0x21   :  { %33 = dma.hbm_to_vmem [thread:$0]  %s310_s1, 512, %s28_s27, [#allocation5], %s253_s22, %s253_s22, %s254_s23  }
  0x22   :  { %248 = dma.done.wait [#allocation3], 256  }
  0x23   :  { %249 = vsyncadd [#allocation3], 4294967040 }
  0x24   :  { %250 = dma.done.wait [#allocation5], 512  }
  0x25   :  { %251 = vsyncadd [#allocation5], 4294966784  ;;  %vm55_vm0 = vcmask 261120   ;;  %v44_v0 = vld [vmem:[#allocation4] sm:$0xff]  ;;  %v45_v1 = vld [vmem:[#allocation4 + $0x8] sm:$0xff]  ;;  %vm155_vm1 = vcmask 64512  }
  0x26   :  { %v46_v2 = vld [vmem:[#allocation4 + $0x10] sm:$0xff]  ;;  %v184_v3 = vpack.c.bf16 %v45_v1, %v44_v0  ;;  %v47_v4 = vld [vmem:[#allocation4 + $0x18] sm:$0xff]  ;;  %v164_v8 = vld [vmem:[%s311_s2] ss:$0 sm:$0xff] }
  0x27   :  { %v42_v5 = vld [vmem:[#allocation2] sm:$0xff]  ;;  %v188_v6 = vpack.c.bf16 %v47_v4, %v46_v2  ;;  %v43_v7 = vld [vmem:[#allocation2 + $0x8] sm:$0xff] }
  0x28   :  { %181 = vmatprep.mubr.msk.f32.mxu0 %vm55_vm0, %v42_v5  ;;  %185 = vmatprep.subr.bf16.mxu0 %v184_v3 }
  0x29   :  { %187 = vmatpush3.bf16.msra.mxu0 %v184_v3 }
  0x2a   :  { %189 = vmatprep.subr.bf16.mxu0 %v188_v6 }
  0x2d   :  { %191 = vmatpush3.bf16.msra.mxu0 %v188_v6 }
  0x30   :  { %182 = vmatmul.mubr.msk.f32.vlgmr.msra.gmra.mrb[0].mxu0 %vm55_vm0, %v43_v7 }
 0x103   :  { %v183_v9 = vpop.f32.mrb[0].mxu0 }
 0x104   :  { %v128_v10 = vpop.f32.mrb[1].mxu0  ;;  %v134_v12 = vadd.f32 %v183_v9, %v164_v8 }
 0x105   :  { %v129_v11 = vadd.f32 %v164_v8, %v128_v10 }
 0x107   :  { %137 = vmax.xlane.f32.xlu0 %v129_v11 }
 0x10b   :  { %139 = vmax.xlane.f32.xlu0 %v134_v12 }
 0x194   :  { %v138_v13 = vpop.xlane.xlu0 %137 }
 0x195   :  { %v141_v14 = vsub.f32 %v129_v11, %v138_v13 }
 0x197   :  { %v143_v15 = vmul.f32 1.442695, %v141_v14 }
 0x198   :  { %v140_v16 = vpop.xlane.xlu0 %139 }
 0x199   :  { %196 = vpow2.f32 %v143_v15  ;;  %v142_v17 = vsub.f32 %v134_v12, %v140_v16 }
 0x19b   :  { %v145_v18 = vmul.f32 1.442695, %v142_v17 }
 0x19d   :  { %198 = vpow2.f32 %v145_v18 }
 0x1a3   :  { %v197_v19 = vpop.eup %196 }
 0x1a4   :  { %147 = vadd.xlane.f32.xlu1 %v197_v19 }
 0x1a7   :  { %v199_v20 = vpop.eup %198 }
 0x1a8   :  { %149 = vadd.xlane.f32.xlu1 %v199_v20 }
 0x231   :  { %v148_v21 = vpop.xlane.xlu1 %147 }
 0x232   :  { %200 = vrcp.f32 %v148_v21 }
 0x235   :  { %v150_v22 = vpop.xlane.xlu1 %149 }
 0x236   :  { %202 = vrcp.f32 %v150_v22 }
 0x23c   :  { %v201_v23 = vpop.eup %200 }
 0x23d   :  { %v153_v24 = vmul.f32 %v201_v23, %v197_v19 }
 0x23f   :  { %156 = vst.msk [vmem:[%s312_s3] sm:$0xff] %vm155_vm1, %v153_v24 }
 0x240   :  { %v203_v25 = vpop.eup %202 }
 0x241   :  { %v154_v26 = vmul.f32 %v203_v25, %v199_v20 }
 0x243   :  { %157 = vst.msk [vmem:[%s312_s3 + $0x8] sm:$0xff] %vm155_vm1, %v154_v26 }
 0x244   :  { %162 = vsyncpa [#allocation3], 1 }
 0x245   :  { %163 = vsyncpa [#allocation5], 1 }

</bundles_post_ra>
